<compile_context>
chip_gen: v7x
topology: tpu7x:2x2x1
jax: 0.10.0
libtpu: 0.0.40
codegen_flags: <defaults>
</compile_context>

<pallas_src>
import functools

import jax
import jax.numpy as jnp
from jax.experimental import pallas as pl
from jax.experimental.pallas import tpu as pltpu


def _round_up(n, m):
    return ((n + m - 1) // m) * m


def _logreg_kernel(x_ref, w_ref, b_ref, o_ref, acc_ref, *, d_total, tile_d, mask_k):
    """One (batch-tile, K-tile) grid step of sigmoid(x @ w + b).

    x_ref:   (TILE_B, TILE_D) VMEM, streamed
    w_ref:   (TILE_D, 1)      VMEM weight column
    b_ref:   (1,)             SMEM scalar bias
    o_ref:   (TILE_B, 1)      VMEM output block (written on last K step)
    acc_ref: (TILE_B, 1)      f32 VMEM accumulator (persists across K steps)
    """
    k = pl.program_id(1)

    @pl.when(k == 0)
    def _():
        acc_ref[...] = jnp.zeros_like(acc_ref)

    x = x_ref[...]
    w = w_ref[...]
    if mask_k:
        # Partial last K block: zero out-of-range columns on both operands so
        # padding garbage (possibly NaN) never reaches the accumulator.
        col_x = k * tile_d + jax.lax.broadcasted_iota(jnp.int32, x.shape, 1)
        x = jnp.where(col_x < d_total, x, 0.0)
        col_w = k * tile_d + jax.lax.broadcasted_iota(jnp.int32, w.shape, 0)
        w = jnp.where(col_w < d_total, w, 0.0)

    # MXU GEMV: the vector-extended slot is otherwise idle; avoids the VPU
    # multiply + XLU cross-lane reduce that bound the previous version.
    acc_ref[...] += jnp.dot(x, w, preferred_element_type=jnp.float32)

    @pl.when(k == pl.num_programs(1) - 1)
    def _():
        o_ref[...] = jax.nn.sigmoid(acc_ref[...] + b_ref[0]).astype(o_ref.dtype)


def logistic_regression_forward(x, w, b):
    """Forward of torch.sigmoid(nn.Linear(D, 1)(x)).

    x: (B, D) f32, w: (1, D) f32 (nn.Linear weight layout), b: (1,) f32.
    Returns (B, 1) f32.
    """
    B, D = x.shape
    assert w.shape == (1, D) and b.shape == (1,)

    w_col = jnp.transpose(w)  # (D, 1): reduction over D runs on the MXU

    # ----- Generation-aware VMEM budget -----------------------------------
    try:
        vmem_cap = int(pltpu.get_tpu_info().vmem_capacity_bytes)
    except Exception:
        vmem_cap = 64 * 1024 * 1024  # conservative (v7x-sized) fallback

    # Double-buffered x traffic gets ~3/8 of VMEM: 24 MiB/buffer on 128 MiB
    # parts (v5e/v6e), 12 MiB/buffer on v7x -- inside the measured 4-32 MiB
    # sweet spot, with headroom for output/weight/scratch/internal.
    x_budget = (vmem_cap * 3) // 8
    vmem_limit = min((vmem_cap * 3) // 4, 96 * 1024 * 1024)
    bytes_per_elt = 4  # f32

    # ----- K (feature) tiling ----------------------------------------------
    # Keep all of D in one block when even a minimal 128-row tile fits the
    # budget; otherwise stream D in 128-aligned chunks and accumulate in VMEM.
    if 2 * 128 * D * bytes_per_elt <= x_budget:
        tile_d = D
    else:
        tile_d = max(128, (x_budget // (2 * 128 * bytes_per_elt)) // 128 * 128)
    num_k = pl.cdiv(D, tile_d)
    mask_k = (D % tile_d) != 0

    # ----- Batch tiling ------------------------------------------------------
    max_tile_b = (x_budget // (2 * tile_d * bytes_per_elt)) // 128 * 128
    max_tile_b = max(128, min(max_tile_b, 32768))
    if B <= max_tile_b:
        # Whole batch fits one block (block == full dim is always legal).
        # Split in two (one tile per v7x TensorCore) only if each half-block
        # stays >= ~4 MiB, otherwise per-step overhead dominates.
        half_b = _round_up((B + 1) // 2, 8)
        if half_b * tile_d * bytes_per_elt >= 4 * 1024 * 1024:
            tile_b = half_b
        else:
            tile_b = B
    else:
        tile_b = max_tile_b  # multiple of 128; Pallas masks the partial tail block
    num_b = pl.cdiv(B, tile_b)  # no jnp.pad: no extra HBM copy of x

    kernel = functools.partial(
        _logreg_kernel, d_total=D, tile_d=tile_d, mask_k=mask_k)

    # TODO(synk): optionally stream x as bf16 (upcast in-kernel) to halve HBM
    # traffic on this bandwidth-bound kernel; kept f32 to match nn.Linear fp32.
    out = pl.pallas_call(
        kernel,
        out_shape=jax.ShapeDtypeStruct((B, 1), jnp.float32),
        grid=(num_b, num_k),
        in_specs=[
            pl.BlockSpec((tile_b, tile_d), lambda i, k: (i, k)),   # streamed x
            pl.BlockSpec((tile_d, 1), lambda i, k: (k, 0)),        # weight column
            pl.BlockSpec(memory_space=pltpu.MemorySpace.SMEM),     # scalar bias
        ],
        out_specs=pl.BlockSpec((tile_b, 1), lambda i, k: (i, 0)),
        scratch_shapes=[pltpu.VMEM((tile_b, 1), jnp.float32)],
        compiler_params=pltpu.CompilerParams(
            dimension_semantics=("parallel", "arbitrary"),
            vmem_limit_bytes=vmem_limit,
        ),
    )(x, w_col, b)

    return out


if __name__ == "__main__":
    key = jax.random.PRNGKey(0)
    kx, kw, kb = jax.random.split(key, 3)

    batch, input_dim = 8, 32

    # Deterministic init mimicking nn.Linear(input_dim, 1):
    # uniform(-1/sqrt(input_dim), 1/sqrt(input_dim)) for weight (1, D) and bias (1,).
    bound = 1.0 / jnp.sqrt(jnp.float32(input_dim))
    w = jax.random.uniform(kw, (1, input_dim), jnp.float32, -bound, bound)
    b = jax.random.uniform(kb, (1,), jnp.float32, -bound, bound)

    x = jax.random.normal(kx, (batch, input_dim), jnp.float32)

    out = logistic_regression_forward(x, w, b)
    out = jax.block_until_ready(out)

    # Reference check against plain JAX (matches torch.sigmoid(nn.Linear(x))).
    ref = jax.nn.sigmoid(x @ w.T + b)
    assert out.shape == (batch, 1)
    assert jnp.allclose(out, ref, atol=1e-5, rtol=1e-5)

    print("KERNEL_OK")
</pallas_src>

<mosaic_0001>
module attributes {stable_mosaic.version = 11 : i64} {
  func.func @_logreg_kernel(%arg0: i32, %arg1: i32, %arg2: memref<8x32xf32, #tpu.memory_space<vmem>>, %arg3: memref<32x1xf32, #tpu.memory_space<vmem>>, %arg4: memref<1xf32, #tpu.memory_space<smem>>, %arg5: memref<8x1xf32, #tpu.memory_space<vmem>>, %arg6: memref<8x1xf32, #tpu.memory_space<vmem>>) attributes {dimension_semantics = [#tpu.dimension_semantics<parallel>, #tpu.dimension_semantics<arbitrary>], iteration_bounds = array<i64: 1, 1>, scalar_prefetch = 0 : i64, scratch_operands = 1 : i64, tpu.core_type = #tpu.core_type<tc>, window_params = [{transform_indices = @transform_0, window_bounds = array<i64: 8, 32>}, {transform_indices = @transform_1, window_bounds = array<i64: 32, 1>}, {transform_indices = @transform_2, window_bounds = array<i64: 1>}, {transform_indices = @transform_3, window_bounds = array<i64: 8, 1>}]} {
    %c0_i32 = arith.constant 0 : i32
    %0 = arith.cmpi eq, %arg1, %c0_i32 : i32
    %1 = arith.extui %0 : i1 to i32
    %c0_i32_0 = arith.constant 0 : i32
    %2 = arith.cmpi ne, %1, %c0_i32_0 : i32
    scf.if %2 {
      %cst_10 = arith.constant 0.000000e+00 : f32
      %12 = vector.broadcast %cst_10 : f32 to vector<8x1xf32>
      %c0_11 = arith.constant 0 : index
      %c0_12 = arith.constant 0 : index
      %13 = vector.load %arg6[%c0_11, %c0_12] : memref<8x1xf32, #tpu.memory_space<vmem>>, vector<8x1xf32>
      tpu.vector_store %arg6[%c0_11, %c0_12], %12 {strides = array<i32>} : memref<8x1xf32, #tpu.memory_space<vmem>>, vector<8x1xf32>,
    } else {
    }
    %c0 = arith.constant 0 : index
    %c0_1 = arith.constant 0 : index
    %3 = vector.load %arg2[%c0, %c0_1] : memref<8x32xf32, #tpu.memory_space<vmem>>, vector<8x32xf32>
    %c0_2 = arith.constant 0 : index
    %c0_3 = arith.constant 0 : index
    %4 = vector.load %arg3[%c0_2, %c0_3] : memref<32x1xf32, #tpu.memory_space<vmem>>, vector<32x1xf32>
    %c0_4 = arith.constant 0 : index
    %c0_5 = arith.constant 0 : index
    %5 = vector.load %arg6[%c0_4, %c0_5] : memref<8x1xf32, #tpu.memory_space<vmem>>, vector<8x1xf32>
    %cst = arith.constant dense<0.000000e+00> : vector<8x1xf32>
    %6 = tpu.matmul %3, %4, %cst {dimension_numbers = #tpu.dot_dimension_numbers<[1], [0], [0], [1], [0, 0, 1, 1], [], []>} : vector<8x32xf32>, vector<32x1xf32>, vector<8x1xf32> -> vector<8x1xf32>
    %7 = arith.addf %5, %6 : vector<8x1xf32>
    %c0_6 = arith.constant 0 : index
    %c0_7 = arith.constant 0 : index
    %8 = vector.load %arg6[%c0_6, %c0_7] : memref<8x1xf32, #tpu.memory_space<vmem>>, vector<8x1xf32>
    tpu.vector_store %arg6[%c0_6, %c0_7], %7 {strides = array<i32>} : memref<8x1xf32, #tpu.memory_space<vmem>>, vector<8x1xf32>,
    %c0_i32_8 = arith.constant 0 : i32
    %9 = arith.cmpi eq, %arg1, %c0_i32_8 : i32
    %10 = arith.extui %9 : i1 to i32
    %c0_i32_9 = arith.constant 0 : i32
    %11 = arith.cmpi ne, %10, %c0_i32_9 : i32
    scf.if %11 {
      %c0_10 = arith.constant 0 : index
      %c0_11 = arith.constant 0 : index
      %12 = vector.load %arg6[%c0_10, %c0_11] : memref<8x1xf32, #tpu.memory_space<vmem>>, vector<8x1xf32>
      %c0_12 = arith.constant 0 : index
      %13 = memref.load %arg4[%c0_12] : memref<1xf32, #tpu.memory_space<smem>>
      %14 = vector.broadcast %13 : f32 to vector<8x1xf32>
      %15 = arith.addf %12, %14 : vector<8x1xf32>
      %16 = arith.negf %15 : vector<8x1xf32>
      %17 = math.exp %16 : vector<8x1xf32>
      %cst_13 = arith.constant 1.000000e+00 : f32
      %18 = vector.broadcast %cst_13 : f32 to vector<8x1xf32>
      %19 = arith.addf %18, %17 : vector<8x1xf32>
      %20 = arith.divf %18, %19 : vector<8x1xf32>
      %c0_14 = arith.constant 0 : index
      %c0_15 = arith.constant 0 : index
      %21 = vector.load %arg5[%c0_14, %c0_15] : memref<8x1xf32, #tpu.memory_space<vmem>>, vector<8x1xf32>
      tpu.vector_store %arg5[%c0_14, %c0_15], %20 {strides = array<i32>} : memref<8x1xf32, #tpu.memory_space<vmem>>, vector<8x1xf32>,
    } else {
    }
    return
  }
  func.func @transform_0(%arg0: i32, %arg1: i32) -> (i32, i32) {
    %c0_i32 = arith.constant 0 : i32
    return %arg0, %arg1 : i32, i32
  }
  func.func @transform_1(%arg0: i32, %arg1: i32) -> (i32, i32) {
    %c0_i32 = arith.constant 0 : i32
    %c0_i32_0 = arith.constant 0 : i32
    return %arg1, %c0_i32 : i32, i32
  }
  func.func @transform_2(%arg0: i32, %arg1: i32) -> i32 {
    %c0_i32 = arith.constant 0 : i32
    %c0_i32_0 = arith.constant 0 : i32
    return %c0_i32 : i32
  }
  func.func @transform_3(%arg0: i32, %arg1: i32) -> (i32, i32) {
    %c0_i32 = arith.constant 0 : i32
    %c0_i32_0 = arith.constant 0 : i32
    return %arg0, %c0_i32 : i32, i32
  }
}

</mosaic_0001>

<bundles_post_ra>
// kernel: tpu_custom_call.1
= control target key start
LH: loop header
LB: loop body
LE: loop exit
PB: predicated region body
PF: predicated region fallthrough
CT: control target
= control target key end

     0   :  { %vm19_vm0 = vcmask 7168   ;;  %v153_v0 = vmov 0.0|0.0   ;;  %v154_v4 = vmov 0.0   ;;  %vm155_vm1 = vmmov 0   ;;  %s200_s1 = inlined_call_operand.vmem [shape: f32[32,1], index: 1, kind: input, shape index: {}]   ;;  %s201_s0 = inlined_call_operand.vmem [shape: f32[8,32], index: 0, kind: input, shape index: {}]   ;;  %s202_s2 = inlined_call_operand.<no memory space> [shape: f32[1], index: 2, kind: input, shape index: {}]   ;;  %s203_s3 = inlined_call_operand.vmem [shape: f32[8,1], index: 3, kind: output, shape index: {}]  }
   0x1   :  { %140 = vmatprep.subr.bf16.mxu0 %v153_v0  ;;  %v22_v1 = vld [vmem:[%s200_s1] sm:$0xff]  ;;  %v23_v2 = vld [vmem:[%s200_s1 + $0x8] sm:$0xff]  ;;  %v24_v3 = vld [vmem:[%s200_s1 + $0x10] sm:$0xff]  ;;  %20 = vst.msk [vmem:[#allocation2] sm:$0xff] %vm19_vm0, %v154_v4  ;;  %137 = vmatprep.mubr.msk.f32.mxu0 %vm155_vm1, %v154_v4  ;;  %vm27_vm2 = vcmask 261120   ;;  %v109_v13 = vstv %s202_s2 }
   0x2   :  { %v141_v5 = vpack.c.bf16 %v23_v2, %v22_v1  ;;  %v25_v6 = vld [vmem:[%s200_s1 + $0x18] sm:$0xff]  ;;  %v21_v8 = vld [vmem:[%s201_s0] sm:$0xff] }
   0x3   :  { %v144_v7 = vpack.c.bf16 %v25_v6, %v24_v3 }
   0x4   :  { %142 = vmatpush3.bf16.msra.mxu0 %v141_v5 }
   0x5   :  { %143 = vmatprep.subr.bf16.mxu0 %v153_v0 }
   0x8   :  { %145 = vmatpush3.bf16.msra.mxu0 %v144_v7  ;;  %v26_v9 = vld [vmem:[#allocation2] sm:$0xff] }
   0xb   :  { %138 = vmatmul.mubr.msk.f32.vlgmr.msra.gmra.mrb[0].mxu0 %vm27_vm2, %v21_v8 }
  0xde   :  { %v97_v10 = vpop.f32.mrb[0].mxu0 }
  0xdf   :  { %v101_v11 = vadd.f32 %v97_v10, %v26_v9  ;;  %v139_v12 = vpop.f32.mrb[1].mxu0 }
  0xe1   :  { %103 = vst.msk [vmem:[#allocation2] sm:$0xff] %vm19_vm0, %v101_v11 }
  0xe8   :  { %v107_v14 = vld [vmem:[#allocation2] sm:$0xff] }
  0xe9   :  { %v110_v15 = vadd.f32 %v109_v13, %v107_v14 }
  0xeb   :  { %v123_v16 = vmul.f32 -1.442695, %v110_v15 }
  0xed   :  { %149 = vpow2.f32 %v123_v16 }
  0xf7   :  { %v150_v17 = vpop.eup %149 }
  0xf8   :  { %v114_v18 = vadd.f32 1.0, %v150_v17 }
  0xfa   :  { %151 = vrcp.f32 %v114_v18 }
 0x104   :  { %v152_v19 = vpop.eup %151 }
 0x105   :  { %117 = vst.msk [vmem:[%s203_s3] sm:$0xff] %vm19_vm0, %v152_v19 }

</bundles_post_ra>
